<compile_context>
chip_gen: v7x
topology: tpu7x:2x2x1
jax: 0.10.0
libtpu: 0.0.40
codegen_flags: <defaults>
</compile_context>

<pallas_src>
import jax
import jax.numpy as jnp
from jax.experimental import pallas as pl
from jax.experimental.pallas import tpu as pltpu


def vae_kernel(params_ref, x_ref, eps_ref, recon_ref, mu_ref, logvar_ref):
    # params_ref lives in SMEM (scalar prefetch): [w11, b11, w12, b12, w2, b2]
    w11 = params_ref[0]
    b11 = params_ref[1]
    w12 = params_ref[2]
    b12 = params_ref[3]
    w2 = params_ref[4]
    b2 = params_ref[5]

    x = x_ref[...]            # (tile_rows, C) f32, lane-dense
    eps = eps_ref[...]        # (tile_rows, C) f32

    # encode: fc11(x), fc12(x)  (Linear(1,1) == scalar affine)
    mu = x * w11 + b11
    logvar = x * w12 + b12

    # reparameterize: z = mu + eps * exp(0.5 * logvar)  (exp -> EUP slot, off VALU)
    std = jnp.exp(0.5 * logvar)
    z = mu + eps * std

    # decode: fc2(z)
    recon = z * w2 + b2

    recon_ref[...] = recon
    mu_ref[...] = mu
    logvar_ref[...] = logvar


def vae_forward(x, eps, params, *, tile_rows=512, lane_width=512):
    """Fused VAE forward.

    x, eps: arrays of identical shape (e.g. (N, 1)), f32.
    params: (6,) f32 = [w11, b11, w12, b12, w2, b2].

    Internally reshapes to a lane-dense (rows, lane_width) slab (lane_width is
    a multiple of 128), pads rows to a multiple of the row tile, and runs a
    1-D row-tiled grid.  Default tile (512, 512) f32 = 1 MiB per array
    => 5 arrays * 2 buffers = 10 MiB, safely under the default scoped VMEM
    limit on v5e (16 MiB), v6e (32 MiB) and v7x (32 MiB).
    """
    assert lane_width % 128 == 0, "lane_width must be a multiple of 128"
    orig_shape = x.shape
    orig_dtype = x.dtype
    n = x.size

    x_flat = x.reshape(-1)
    eps_flat = eps.reshape(-1)

    # Lane-dense slab: rows x lane_width.
    rows = pl.cdiv(n, lane_width)
    # Row tile: full extent if the array is smaller than one tile (satisfies
    # the (8,128) block constraint via "block == full dim"), otherwise the
    # requested tile (a multiple of 8).
    tr = rows if rows < tile_rows else tile_rows
    rows_padded = pl.cdiv(rows, tr) * tr
    n_padded = rows_padded * lane_width

    pad = n_padded - n
    if pad:
        x_flat = jnp.pad(x_flat, (0, pad))
        eps_flat = jnp.pad(eps_flat, (0, pad))

    x2d = x_flat.reshape(rows_padded, lane_width)
    eps2d = eps_flat.reshape(rows_padded, lane_width)

    num_tiles = rows_padded // tr
    sds = jax.ShapeDtypeStruct((rows_padded, lane_width), orig_dtype)

    # The scalar-prefetch ref (params) is passed positionally to every index_map.
    tile_spec = pl.BlockSpec((tr, lane_width), lambda i, params_ref: (i, 0))

    recon2d, mu2d, logvar2d = pl.pallas_call(
        vae_kernel,
        out_shape=(sds, sds, sds),
        grid_spec=pltpu.PrefetchScalarGridSpec(
            num_scalar_prefetch=1,              # params -> SMEM
            grid=(num_tiles,),
            in_specs=[tile_spec, tile_spec],    # x, eps
            out_specs=(tile_spec, tile_spec, tile_spec),
        ),
        compiler_params=pltpu.CompilerParams(
            # The row-tile axis is fully independent -> shard across TCs on
            # v7x, harmless on single-TC v5e/v6e.
            dimension_semantics=("parallel",),
        ),
        cost_estimate=pl.CostEstimate(
            flops=9 * n_padded,                 # ~3 FMAs + a few muls/adds per elem
            transcendentals=n_padded,           # one exp per elem
            bytes_accessed=20 * n_padded,       # 5 f32 streams (2 in, 3 out)
        ),
    )(params, x2d, eps2d)

    def unpack(a):
        return a.reshape(-1)[:n].reshape(orig_shape)

    return unpack(recon2d), unpack(mu2d), unpack(logvar2d)


def reference_forward(x, eps, params):
    w11, b11, w12, b12, w2, b2 = [params[i] for i in range(6)]
    mu = x * w11 + b11
    logvar = x * w12 + b12
    std = jnp.exp(0.5 * logvar)
    z = mu + eps * std
    return z * w2 + b2, mu, logvar


if __name__ == "__main__":
    key = jax.random.PRNGKey(0)
    k_x, k_eps, k_w, k_x2, k_eps2 = jax.random.split(key, 5)

    # Deterministic parameter init. PyTorch Linear(1,1) default init draws
    # weight & bias from U(-1, 1) (fan_in = 1); reproduce that distributionally.
    params = jax.random.uniform(k_w, (6,), dtype=jnp.float32, minval=-1.0, maxval=1.0)

    # --- Test 1: small batch of scalar features, matching Linear(1, 1). -----
    N = 8
    x = jax.random.normal(k_x, (N, 1), dtype=jnp.float32)
    eps = jax.random.normal(k_eps, (N, 1), dtype=jnp.float32)

    recon, mu, logvar = vae_forward(x, eps, params)
    jax.block_until_ready((recon, mu, logvar))

    recon_r, mu_r, logvar_r = reference_forward(x, eps, params)
    assert recon.shape == x.shape and mu.shape == x.shape and logvar.shape == x.shape
    assert jnp.allclose(recon, recon_r, atol=1e-5, rtol=1e-5)
    assert jnp.allclose(mu, mu_r, atol=1e-5, rtol=1e-5)
    assert jnp.allclose(logvar, logvar_r, atol=1e-5, rtol=1e-5)

    # --- Test 2: exercise the multi-tile grid path (small tiles, N=4096). ---
    N2 = 4096
    x2 = jax.random.normal(k_x2, (N2, 1), dtype=jnp.float32)
    eps2 = jax.random.normal(k_eps2, (N2, 1), dtype=jnp.float32)

    recon2, mu2, logvar2 = vae_forward(x2, eps2, params, tile_rows=8, lane_width=128)
    jax.block_until_ready((recon2, mu2, logvar2))

    recon2_r, mu2_r, logvar2_r = reference_forward(x2, eps2, params)
    assert jnp.allclose(recon2, recon2_r, atol=1e-5, rtol=1e-5)
    assert jnp.allclose(mu2, mu2_r, atol=1e-5, rtol=1e-5)
    assert jnp.allclose(logvar2, logvar2_r, atol=1e-5, rtol=1e-5)

    print("KERNEL_OK")
</pallas_src>

<mosaic_0001>
module attributes {stable_mosaic.version = 11 : i64} {
  func.func @vae_kernel(%arg0: i32, %arg1: memref<6xf32, #tpu.memory_space<smem>>, %arg2: memref<1x512xf32, #tpu.memory_space<vmem>>, %arg3: memref<1x512xf32, #tpu.memory_space<vmem>>, %arg4: memref<1x512xf32, #tpu.memory_space<vmem>>, %arg5: memref<1x512xf32, #tpu.memory_space<vmem>>, %arg6: memref<1x512xf32, #tpu.memory_space<vmem>>) attributes {dimension_semantics = [#tpu.dimension_semantics<parallel>], iteration_bounds = array<i64: 1>, scalar_prefetch = 1 : i64, scratch_operands = 0 : i64, tpu.core_type = #tpu.core_type<tc>, window_params = [{transform_indices = @transform_0, window_bounds = array<i64: 1, 512>}, {transform_indices = @transform_1, window_bounds = array<i64: 1, 512>}, {transform_indices = @transform_2, window_bounds = array<i64: 1, 512>}, {transform_indices = @transform_3, window_bounds = array<i64: 1, 512>}, {transform_indices = @transform_4, window_bounds = array<i64: 1, 512>}]} {
    %c0 = arith.constant 0 : index
    %0 = memref.load %arg1[%c0] : memref<6xf32, #tpu.memory_space<smem>>
    %c1 = arith.constant 1 : index
    %1 = memref.load %arg1[%c1] : memref<6xf32, #tpu.memory_space<smem>>
    %c2 = arith.constant 2 : index
    %2 = memref.load %arg1[%c2] : memref<6xf32, #tpu.memory_space<smem>>
    %c3 = arith.constant 3 : index
    %3 = memref.load %arg1[%c3] : memref<6xf32, #tpu.memory_space<smem>>
    %c4 = arith.constant 4 : index
    %4 = memref.load %arg1[%c4] : memref<6xf32, #tpu.memory_space<smem>>
    %c5 = arith.constant 5 : index
    %5 = memref.load %arg1[%c5] : memref<6xf32, #tpu.memory_space<smem>>
    %c0_0 = arith.constant 0 : index
    %c0_1 = arith.constant 0 : index
    %6 = vector.load %arg2[%c0_0, %c0_1] : memref<1x512xf32, #tpu.memory_space<vmem>>, vector<1x512xf32>
    %c0_2 = arith.constant 0 : index
    %c0_3 = arith.constant 0 : index
    %7 = vector.load %arg3[%c0_2, %c0_3] : memref<1x512xf32, #tpu.memory_space<vmem>>, vector<1x512xf32>
    %8 = vector.broadcast %0 : f32 to vector<1x512xf32>
    %9 = arith.mulf %6, %8 : vector<1x512xf32>
    %10 = vector.broadcast %1 : f32 to vector<1x512xf32>
    %11 = arith.addf %9, %10 : vector<1x512xf32>
    %12 = vector.broadcast %2 : f32 to vector<1x512xf32>
    %13 = arith.mulf %6, %12 : vector<1x512xf32>
    %14 = vector.broadcast %3 : f32 to vector<1x512xf32>
    %15 = arith.addf %13, %14 : vector<1x512xf32>
    %cst = arith.constant 5.000000e-01 : f32
    %16 = vector.broadcast %cst : f32 to vector<1x512xf32>
    %17 = arith.mulf %16, %15 : vector<1x512xf32>
    %18 = math.exp %17 : vector<1x512xf32>
    %19 = arith.mulf %7, %18 : vector<1x512xf32>
    %20 = arith.addf %11, %19 : vector<1x512xf32>
    %21 = vector.broadcast %4 : f32 to vector<1x512xf32>
    %22 = arith.mulf %20, %21 : vector<1x512xf32>
    %23 = vector.broadcast %5 : f32 to vector<1x512xf32>
    %24 = arith.addf %22, %23 : vector<1x512xf32>
    %c0_4 = arith.constant 0 : index
    %c0_5 = arith.constant 0 : index
    %25 = vector.load %arg4[%c0_4, %c0_5] : memref<1x512xf32, #tpu.memory_space<vmem>>, vector<1x512xf32>
    tpu.vector_store %arg4[%c0_4, %c0_5], %24 {strides = array<i32>} : memref<1x512xf32, #tpu.memory_space<vmem>>, vector<1x512xf32>,
    %c0_6 = arith.constant 0 : index
    %c0_7 = arith.constant 0 : index
    %26 = vector.load %arg5[%c0_6, %c0_7] : memref<1x512xf32, #tpu.memory_space<vmem>>, vector<1x512xf32>
    tpu.vector_store %arg5[%c0_6, %c0_7], %11 {strides = array<i32>} : memref<1x512xf32, #tpu.memory_space<vmem>>, vector<1x512xf32>,
    %c0_8 = arith.constant 0 : index
    %c0_9 = arith.constant 0 : index
    %27 = vector.load %arg6[%c0_8, %c0_9] : memref<1x512xf32, #tpu.memory_space<vmem>>, vector<1x512xf32>
    tpu.vector_store %arg6[%c0_8, %c0_9], %15 {strides = array<i32>} : memref<1x512xf32, #tpu.memory_space<vmem>>, vector<1x512xf32>,
    return
  }
  func.func @transform_0(%arg0: i32, %arg1: memref<6xf32, #tpu.memory_space<smem>>) -> (i32, i32) {
    %c0_i32 = arith.constant 0 : i32
    %c0_i32_0 = arith.constant 0 : i32
    return %arg0, %c0_i32 : i32, i32
  }
  func.func @transform_1(%arg0: i32, %arg1: memref<6xf32, #tpu.memory_space<smem>>) -> (i32, i32) {
    %c0_i32 = arith.constant 0 : i32
    %c0_i32_0 = arith.constant 0 : i32
    return %arg0, %c0_i32 : i32, i32
  }
  func.func @transform_2(%arg0: i32, %arg1: memref<6xf32, #tpu.memory_space<smem>>) -> (i32, i32) {
    %c0_i32 = arith.constant 0 : i32
    %c0_i32_0 = arith.constant 0 : i32
    return %arg0, %c0_i32 : i32, i32
  }
  func.func @transform_3(%arg0: i32, %arg1: memref<6xf32, #tpu.memory_space<smem>>) -> (i32, i32) {
    %c0_i32 = arith.constant 0 : i32
    %c0_i32_0 = arith.constant 0 : i32
    return %arg0, %c0_i32 : i32, i32
  }
  func.func @transform_4(%arg0: i32, %arg1: memref<6xf32, #tpu.memory_space<smem>>) -> (i32, i32) {
    %c0_i32 = arith.constant 0 : i32
    %c0_i32_0 = arith.constant 0 : i32
    return %arg0, %c0_i32 : i32, i32
  }
}

</mosaic_0001>

<bundles_post_ra>
// kernel: tpu_custom_call.1
= control target key start
LH: loop header
LB: loop body
LE: loop exit
PB: predicated region body
PF: predicated region fallthrough
CT: control target
= control target key end

     0   :  { %s340_s0 = inlined_call_operand.hbm [shape: f32[6], index: 0, kind: input, shape index: {}]   ;;  %s341_s1 = inlined_call_operand.hbm [shape: f32[1,512], index: 1, kind: input, shape index: {}]   ;;  %s342_s2 = inlined_call_operand.vmem [shape: f32[1,512], index: 2, kind: input, shape index: {}]   ;;  %s343_s3 = inlined_call_operand.hbm [shape: f32[1,512], index: 3, kind: output, shape index: {0}]   ;;  %s344_s4 = inlined_call_operand.hbm [shape: f32[1,512], index: 4, kind: output, shape index: {1}]   ;;  %s345_s5 = inlined_call_operand.hbm [shape: f32[1,512], index: 5, kind: output, shape index: {2}]  }
   0x1   :  { %s119_s20 = scalar_lea.hbm %s340_s0, 16 }
   0x2   :  { %p120_p0 = scmp.ne.s32.totalorder %s340_s0, %s119_s20  ;;  %p123_p1 = scmp.lt.u32.totalorder %s119_s20, %s340_s0 }
   0x4   :  { %p125_p2 = pnand %p123_p1, %p120_p0 }
   0x6   :  { %128 = shalt.err (!%p125_p2)  }
   0x7   :  { %s225_s25 = smov [#allocation3]  }
   0x8   :  { %12 = dma.hbm_to_smem %s340_s0, 16, %s225_s25, [#allocation2] }
   0x9   :  { %217 = dma.done.wait [#allocation2], 16 }
   0xa   :  { %218 = vsyncadd [#allocation2], 4294967280 }
   0xb   :  { %14 = sfence }
   0xc   :  { %15 = vsyncpa [#allocation5], 0 }
   0xd   :  { %16 = vsyncpa [#allocation6], 0 }
   0xe   :  { %17 = vsyncpa [#allocation9], 0  ;;  %s226_s28 = smov [#allocation4]   ;;  %s129_s7 = scalar_lea.hbm %s341_s1, 64 }
   0xf   :  { %s24_s29 = sshll.u32 %s226_s28, 4  ;;  %p130_p3 = scmp.ne.s32.totalorder %s341_s1, %s129_s7  ;;  %s25_s29 = int_to_ptr.vmem [resolvable:$true] %s24_s29 }
  0x10   :  { %p133_p4 = scmp.lt.u32.totalorder %s129_s7, %s341_s1 }
  0x12   :  { %p135_p5 = pnand %p133_p4, %p130_p3 }
  0x14   :  { %138 = shalt.err (!%p135_p5)
}
  0x15   :  { %s139_s0 = scalar_lea.vmem %s25_s29, 64  ;;  %p144_p7 = scmp.lt.s32.totalorder %s25_s29, %s25_s29 }
  0x16   :  { %p140_p6 = scmp.ne.s32.totalorder %s25_s29, %s139_s0  ;;  %p145_p8 = scmp.lt.s32.totalorder %s139_s0, %s139_s0 }
  0x18   :  { %p146_p9 = por %p145_p8, %p144_p7 }
  0x1a   :  { %p147_p10 = pnand %p146_p9, %p140_p6 }
  0x1c   :  { %150 = shalt.err (!%p147_p10)
}
  0x1d   :  { %27 = dma.hbm_to_vmem [thread:$0]  %s341_s1, 64, %s25_s29, [#allocation5]  }
  0x1e   :  { %219 = dma.done.wait [#allocation5], 64  }
  0x1f   :  { %220 = vsyncadd [#allocation5], 4294967232  ;;  %s33_s14 = sld [smem:[#allocation3]]  ;;  %s107_s15 = sld [smem:[#allocation3 + $0x1]]  ;;  %v58_v0 = vlaneseq  ;;  %v39_v1 = vld [vmem:[#allocation4] sm:$0xf] }
  0x20   :  { %s108_s16 = sld [smem:[#allocation3 + $0x2]]  ;;  %s109_s17 = sld [smem:[#allocation3 + $0x3]] }
  0x21   :  { %s227_s18 = smov [#allocation8]   ;;  %s228_s20 = smov [#allocation10]   ;;  %vm284_vm0 = vcmp.lt.s32.totalorder %v58_v0, 512 }
  0x22   :  { %s81_s19 = sshll.u32 %s227_s18, 4  ;;  %s91_s21 = sshll.u32 %s228_s20, 4  ;;  %s82_s19 = int_to_ptr.vmem [resolvable:$true] %s81_s19  ;;  %s288_s21 = int_to_ptr.vmem [resolvable:$true] %s91_s21 }
  0x23   :  { %s151_s1 = scalar_lea.vmem %s82_s19, 64  ;;  %p156_p12 = scmp.lt.s32.totalorder %s82_s19, %s82_s19 }
  0x24   :  { %p152_p11 = scmp.ne.s32.totalorder %s82_s19, %s151_s1  ;;  %p157_p13 = scmp.lt.s32.totalorder %s151_s1, %s151_s1 }
  0x25   :  { %v41_v2 = vstv %s33_s14  ;;  %v43_v3 = vstv %s107_s15 }
  0x26   :  { %v42_v4 = vmul.f32 %v41_v2, %v39_v1  ;;  %v45_v5 = vstv %s108_s16  ;;  %v47_v6 = vstv %s109_s17  ;;  %p158_p0 = por %p157_p13, %p156_p12 }
  0x27   :  { %v46_v7 = vmul.f32 %v45_v5, %v39_v1 }
  0x28   :  { %v44_v9 = vadd.f32 %v43_v3, %v42_v4  ;;  %p159_p1 = pnand %p158_p0, %p152_p11 }
  0x29   :  { %v48_v10 = vadd.f32 %v47_v6, %v46_v7 }
  0x2a   :  { %63 = vst.msk [vmem:[#allocation8] sm:$0xf] %vm284_vm0, %v44_v9 }
  0x2b   :  { %v49_v11 = vmul.f32 0.5, %v48_v10  ;;  %64 = vst.msk [vmem:[#allocation10] sm:$0xf] %vm284_vm0, %v48_v10 }
  0x2c   :  { %162 = shalt.err (!%p159_p1)
}
  0x2d   :  { %s163_s24 = scalar_lea.hbm %s344_s4, 64 }
  0x2e   :  { %p164_p2 = scmp.ne.s32.totalorder %s344_s4, %s163_s24  ;;  %p167_p3 = scmp.lt.u32.totalorder %s163_s24, %s344_s4 }
  0x30   :  { %p169_p4 = pnand %p167_p3, %p164_p2 }
  0x32   :  { %172 = shalt.err (!%p169_p4)
}
  0x33   :  { %84 = dma.vmem_to_hbm [thread:$0]  %s82_s19, 64, %s344_s4, [#allocation9]  }
  0x34   :  { %s173_s6 = scalar_lea.vmem %s288_s21, 64  ;;  %p178_p6 = scmp.lt.s32.totalorder %s288_s21, %s288_s21 }
  0x35   :  { %p174_p5 = scmp.ne.s32.totalorder %s288_s21, %s173_s6  ;;  %p179_p7 = scmp.lt.s32.totalorder %s173_s6, %s173_s6 }
  0x37   :  { %p180_p8 = por %p179_p7, %p178_p6 }
  0x39   :  { %p181_p9 = pnand %p180_p8, %p174_p5 }
  0x3b   :  { %184 = shalt.err (!%p181_p9)
}
  0x3c   :  { %s185_s9 = scalar_lea.hbm %s345_s5, 64 }
  0x3d   :  { %p186_p10 = scmp.ne.s32.totalorder %s345_s5, %s185_s9  ;;  %p189_p11 = scmp.lt.u32.totalorder %s185_s9, %s345_s5 }
  0x3f   :  { %p191_p12 = pnand %p189_p11, %p186_p10 }
  0x41   :  { %194 = shalt.err (!%p191_p12)
}
  0x42   :  { %94 = dma.vmem_to_hbm [thread:$0]  %s288_s21, 64, %s345_s5, [#allocation9]   ;;  %v50_v12 = vmul.f32 1.442695, %v49_v11  ;;  %v40_v13 = vld [vmem:[%s342_s2] sm:$0xf] }
  0x43   :  { %s110_s14 = sld [smem:[#allocation3 + $0x4]]  ;;  %s111_s15 = sld [smem:[#allocation3 + $0x5]] }
  0x44   :  { %117 = vpow2.f32 %v50_v12  ;;  %s229_s18 = smov [#allocation7]  }
  0x45   :  { %s71_s19 = sshll.u32 %s229_s18, 4  ;;  %s72_s19 = int_to_ptr.vmem [resolvable:$true] %s71_s19 }
  0x46   :  { %s195_s5 = scalar_lea.vmem %s72_s19, 64  ;;  %p200_p0 = scmp.lt.s32.totalorder %s72_s19, %s72_s19 }
  0x47   :  { %p196_p13 = scmp.ne.s32.totalorder %s72_s19, %s195_s5  ;;  %p201_p1 = scmp.lt.s32.totalorder %s195_s5, %s195_s5 }
  0x49   :  { %v54_v16 = vstv %s110_s14  ;;  %v56_v18 = vstv %s111_s15  ;;  %p202_p2 = por %p201_p1, %p200_p0 }
  0x4b   :  { %p203_p3 = pnand %p202_p2, %p196_p13 }
  0x4e   :  { %v118_v14 = vpop.eup %117 }
  0x4f   :  { %v52_v15 = vmul.f32 %v118_v14, %v40_v13 }
  0x51   :  { %v53_v17 = vadd.f32 %v52_v15, %v44_v9 }
  0x53   :  { %v55_v19 = vmul.f32 %v54_v16, %v53_v17 }
  0x55   :  { %v57_v20 = vadd.f32 %v56_v18, %v55_v19 }
  0x57   :  { %62 = vst.msk [vmem:[#allocation7] sm:$0xf] %vm284_vm0, %v57_v20 }
  0x58   :  { %206 = shalt.err (!%p203_p3)
}
  0x59   :  { %s207_s21 = scalar_lea.hbm %s343_s3, 64 }
  0x5a   :  { %p208_p4 = scmp.ne.s32.totalorder %s343_s3, %s207_s21  ;;  %p211_p5 = scmp.lt.u32.totalorder %s207_s21, %s343_s3 }
  0x5c   :  { %p213_p6 = pnand %p211_p5, %p208_p4 }
  0x5e   :  { %216 = shalt.err (!%p213_p6)
}
  0x5f   :  { %74 = dma.vmem_to_hbm [thread:$0]  %s72_s19, 64, %s343_s3, [#allocation6]  }
  0x60   :  { %221 = dma.done.wait [#allocation6], 64  }
  0x61   :  { %222 = vsyncadd [#allocation6], 4294967232 }
  0x62   :  { %223 = dma.done.wait [#allocation9], 128  }
  0x63   :  { %224 = vsyncadd [#allocation9], 4294967168 }
  0x64   :  { %104 = vsyncpa [#allocation5], 1 }
  0x65   :  { %105 = vsyncpa [#allocation6], 1 }
  0x66   :  { %106 = vsyncpa [#allocation9], 1 }

</bundles_post_ra>
